<compile_context>
chip_gen: v7x
topology: tpu7x:2x2x1
jax: 0.10.0
libtpu: 0.0.40
codegen_flags: <defaults>
</compile_context>

<pallas_src>
import functools

import jax
import jax.numpy as jnp
from jax.experimental import pallas as pl
from jax.experimental.pallas import tpu as pltpu


def _double_conv_kernel(x_ref, w1_ref, w2_ref, sb1_ref, sb2_ref, o_ref, h_scr):
    """Fused (conv3x3 + BN + ReLU) x 2 for one image per grid step.

    Shapes (Wi = W + 2):
      x_ref  : (1, H+2, Wi*Cin)      zero-padded input, (w, c) flattened on lanes
      w1_ref : (3, Wi*Cin, Wi*Cmid)  banded conv1 weights, one slab per dy
      w2_ref : (3, Wi*Cmid, W*Cout)  banded conv2 weights, one slab per dy
      sb1_ref: (2, Wi*Cmid)          [scale; bias] stage 1 (zero in the W-halo cols)
      sb2_ref: (2, W*Cout)           [scale; bias] stage 2
      o_ref  : (1, H, W*Cout)
      h_scr  : (H+2, Wi*Cmid)        VMEM scratch: padded intermediate activation
    """
    H = o_ref.shape[1]
    x = x_ref[0]                                    # (H+2, Wi*Cin)

    # ---- stage 1: conv1 as 3 accumulating matmuls (one per kernel row dy) ----
    acc = jnp.dot(x[0:H, :], w1_ref[0], preferred_element_type=jnp.float32)
    acc += jnp.dot(x[1:H + 1, :], w1_ref[1], preferred_element_type=jnp.float32)
    acc += jnp.dot(x[2:H + 2, :], w1_ref[2], preferred_element_type=jnp.float32)
    # Folded (conv bias + BatchNorm) affine + ReLU.  scale/bias are zero in the
    # W-halo columns, so the intermediate's W halo comes out exactly 0.
    h1 = jnp.maximum(acc * sb1_ref[0:1, :] + sb1_ref[1:2, :], 0.0)

    # Intermediate lives entirely in VMEM (no HBM round trip); rows 0 and H+1 are
    # the zero halo rows that conv2's padding=1 needs.
    zero_row = jnp.zeros((1, h_scr.shape[1]), h_scr.dtype)
    h_scr[0:1, :] = zero_row
    h_scr[H + 1:H + 2, :] = zero_row
    h_scr[1:H + 1, :] = h1.astype(h_scr.dtype)

    # ---- stage 2: conv2 + folded BN + ReLU ------------------------------------
    acc2 = jnp.dot(h_scr[0:H, :], w2_ref[0], preferred_element_type=jnp.float32)
    acc2 += jnp.dot(h_scr[1:H + 1, :], w2_ref[1], preferred_element_type=jnp.float32)
    acc2 += jnp.dot(h_scr[2:H + 2, :], w2_ref[2], preferred_element_type=jnp.float32)
    out = jnp.maximum(acc2 * sb2_ref[0:1, :] + sb2_ref[1:2, :], 0.0)

    o_ref[...] = out[None].astype(o_ref.dtype)      # single lane-dense store


def _banded_conv_weights(w_hwio, W, pad_out):
    """(3,3,Ci,Co) HWIO conv weights -> 3 banded matrices for matmul-along-W.

    Returns (3, (W+2)*Ci, Wo*Co) with Wo = W+2 (output keeps a zero W halo) if
    pad_out else W.  Slab dy, column w_out*Co+co holds w_hwio[dy, dx, ci, co] at
    row (w_out-off+dx)*Ci+ci, so `x_row @ slab` performs the conv along W.
    """
    _, _, Ci, Co = w_hwio.shape
    Wo = W + 2 if pad_out else W
    off = 1 if pad_out else 0
    w_orig = jnp.arange(Wo) - off                            # output pixel index (or halo)
    valid = (w_orig >= 0) & (w_orig < W)
    w_in = jnp.arange(W + 2)
    dx = jnp.arange(3)
    # S[x, i, w] = 1 iff padded-input column i feeds output column w via tap dx=x.
    S = ((w_in[None, :, None] == w_orig[None, None, :] + dx[:, None, None])
         & valid[None, None, :]).astype(w_hwio.dtype)
    big = jnp.einsum("xiw,yxco->yicwo", S, w_hwio)           # (3, W+2, Ci, Wo, Co)
    return big.reshape(3, (W + 2) * Ci, Wo * Co)


def _lane_affine(scale, bias, W, pad):
    """Tile per-channel scale/bias across W (optionally with zero halo blocks)."""
    C = scale.shape[0]
    s = jnp.tile(scale, W)
    b = jnp.tile(bias, W)
    if pad:
        z = jnp.zeros((C,), scale.dtype)
        s = jnp.concatenate([z, s, z])
        b = jnp.concatenate([z, b, z])
    return jnp.stack([s, b])                                 # (2, Wo*C)


@functools.partial(jax.jit, static_argnames=("use_bf16",))
def double_conv_forward(x_nchw, params, use_bf16=False, eps=1e-5):
    """DoubleConv forward (inference). Input/output are NCHW like PyTorch."""
    N, Cin, H, W = x_nchw.shape
    Cmid = params["w1"].shape[-1]
    Cout = params["w2"].shape[-1]
    Wi = W + 2

    # Fold conv bias + BatchNorm (running stats) into a single per-channel affine.
    s1 = params["bn1_gamma"] * jax.lax.rsqrt(params["bn1_var"] + eps)
    t1 = params["bn1_beta"] + (params["b1"] - params["bn1_mean"]) * s1
    s2 = params["bn2_gamma"] * jax.lax.rsqrt(params["bn2_var"] + eps)
    t2 = params["bn2_beta"] + (params["b2"] - params["bn2_mean"]) * s2

    w1_big = _banded_conv_weights(params["w1"], W, pad_out=True)    # (3, Wi*Cin,  Wi*Cmid)
    w2_big = _banded_conv_weights(params["w2"], W, pad_out=False)   # (3, Wi*Cmid, W*Cout)
    sb1 = _lane_affine(s1, t1, W, pad=True)                         # (2, Wi*Cmid)
    sb2 = _lane_affine(s2, t2, W, pad=False)                        # (2, W*Cout)

    # NCHW -> NHWC -> zero-pad H/W by 1 -> flatten (W, C) onto the lane axis.
    x = jnp.transpose(x_nchw, (0, 2, 3, 1))
    x = jnp.pad(x, ((0, 0), (1, 1), (1, 1), (0, 0)))
    x2d = x.reshape(N, H + 2, Wi * Cin)

    cdt = jnp.bfloat16 if use_bf16 else jnp.float32
    x2d = x2d.astype(cdt)
    w1_big = w1_big.astype(cdt)
    w2_big = w2_big.astype(cdt)

    out2d = pl.pallas_call(
        _double_conv_kernel,
        out_shape=jax.ShapeDtypeStruct((N, H, W * Cout), jnp.float32),
        grid_spec=pltpu.PrefetchScalarGridSpec(
            num_scalar_prefetch=0,
            grid=(N,),
            in_specs=[
                pl.BlockSpec((1, H + 2, Wi * Cin), lambda n: (n, 0, 0)),
                pl.BlockSpec((3, Wi * Cin, Wi * Cmid), lambda n: (0, 0, 0)),
                pl.BlockSpec((3, Wi * Cmid, W * Cout), lambda n: (0, 0, 0)),
                pl.BlockSpec((2, Wi * Cmid), lambda n: (0, 0)),
                pl.BlockSpec((2, W * Cout), lambda n: (0, 0)),
            ],
            out_specs=pl.BlockSpec((1, H, W * Cout), lambda n: (n, 0, 0)),
            scratch_shapes=[pltpu.VMEM((H + 2, Wi * Cmid), cdt)],
        ),
        compiler_params=pltpu.CompilerParams(
            dimension_semantics=("parallel",),
        ),
    )(x2d, w1_big, w2_big, sb1, sb2)

    out = out2d.reshape(N, H, W, Cout)
    return jnp.transpose(out, (0, 3, 1, 2))                  # NHWC(flattened) -> NCHW


def _reference_forward(x_nchw, params, eps=1e-5):
    """Pure-JAX reference (lax conv, NCHW) for a silent correctness check."""
    def block(x, w_hwio, b, g, be, m, v):
        w_oihw = jnp.transpose(w_hwio, (3, 2, 0, 1))
        y = jax.lax.conv_general_dilated(
            x, w_oihw, window_strides=(1, 1), padding=((1, 1), (1, 1)),
            dimension_numbers=("NCHW", "OIHW", "NCHW"))
        y = y + b[None, :, None, None]
        y = (y - m[None, :, None, None]) / jnp.sqrt(v[None, :, None, None] + eps)
        y = y * g[None, :, None, None] + be[None, :, None, None]
        return jnp.maximum(y, 0.0)

    y = block(x_nchw, params["w1"], params["b1"], params["bn1_gamma"],
              params["bn1_beta"], params["bn1_mean"], params["bn1_var"])
    y = block(y, params["w2"], params["b2"], params["bn2_gamma"],
              params["bn2_beta"], params["bn2_mean"], params["bn2_var"])
    return y


def init_params(key, in_channels, out_channels):
    ks = jax.random.split(key, 8)
    p = {}
    # Conv weights stored HWIO; PyTorch shape would be (Cout, Cin, 3, 3).
    p["w1"] = 0.1 * jax.random.normal(ks[0], (3, 3, in_channels, out_channels), jnp.float32)
    p["b1"] = 0.05 * jax.random.normal(ks[1], (out_channels,), jnp.float32)
    p["w2"] = 0.1 * jax.random.normal(ks[2], (3, 3, out_channels, out_channels), jnp.float32)
    p["b2"] = 0.05 * jax.random.normal(ks[3], (out_channels,), jnp.float32)
    # BatchNorm parameters / running stats (deterministic, non-trivial).
    p["bn1_gamma"] = 1.0 + 0.1 * jax.random.normal(ks[4], (out_channels,), jnp.float32)
    p["bn1_beta"] = 0.1 * jax.random.normal(ks[5], (out_channels,), jnp.float32)
    p["bn1_mean"] = 0.05 * jax.random.normal(ks[6], (out_channels,), jnp.float32)
    p["bn1_var"] = jnp.abs(1.0 + 0.1 * jax.random.normal(ks[7], (out_channels,), jnp.float32))
    p["bn2_gamma"] = p["bn1_gamma"] * 0.9
    p["bn2_beta"] = p["bn1_beta"] * 0.5
    p["bn2_mean"] = p["bn1_mean"] * 0.3
    p["bn2_var"] = p["bn1_var"] * 1.1
    return p


if __name__ == "__main__":
    key = jax.random.PRNGKey(0)
    k_x, k_p = jax.random.split(key)

    N, C_in, C_out, H, W = 2, 4, 8, 16, 16
    x = jax.random.normal(k_x, (N, C_in, H, W), jnp.float32)  # NCHW, like PyTorch
    params = init_params(k_p, C_in, C_out)

    out = double_conv_forward(x, params)
    out = jax.block_until_ready(out)

    ref = _reference_forward(x, params)
    assert out.shape == (N, C_out, H, W)
    assert jnp.allclose(out, ref, atol=1e-4, rtol=1e-4), "mismatch vs JAX reference"

    print("KERNEL_OK")
</pallas_src>

<mosaic_0001>
module attributes {stable_mosaic.version = 11 : i64} {
  func.func @_double_conv_kernel(%arg0: i32, %arg1: memref<1x18x72xf32, #tpu.memory_space<vmem>>, %arg2: memref<3x72x144xf32, #tpu.memory_space<vmem>>, %arg3: memref<3x144x128xf32, #tpu.memory_space<vmem>>, %arg4: memref<2x144xf32, #tpu.memory_space<vmem>>, %arg5: memref<2x128xf32, #tpu.memory_space<vmem>>, %arg6: memref<1x16x128xf32, #tpu.memory_space<vmem>>, %arg7: memref<18x144xf32, #tpu.memory_space<vmem>>) attributes {dimension_semantics = [#tpu.dimension_semantics<parallel>], iteration_bounds = array<i64: 2>, scalar_prefetch = 0 : i64, scratch_operands = 1 : i64, tpu.core_type = #tpu.core_type<tc>, window_params = [{transform_indices = @transform_0, window_bounds = array<i64: 1, 18, 72>}, {pipeline_mode = #tpu.pipeline_mode<synchronous>, transform_indices = @transform_1, window_bounds = array<i64: 3, 72, 144>}, {pipeline_mode = #tpu.pipeline_mode<synchronous>, transform_indices = @transform_2, window_bounds = array<i64: 3, 144, 128>}, {pipeline_mode = #tpu.pipeline_mode<synchronous>, transform_indices = @transform_3, window_bounds = array<i64: 2, 144>}, {pipeline_mode = #tpu.pipeline_mode<synchronous>, transform_indices = @transform_4, window_bounds = array<i64: 2, 128>}, {transform_indices = @transform_5, window_bounds = array<i64: 1, 16, 128>}]} {
    %c0 = arith.constant 0 : index
    %c0_0 = arith.constant 0 : index
    %c0_1 = arith.constant 0 : index
    %0 = vector.load %arg1[%c0, %c0_0, %c0_1] : memref<1x18x72xf32, #tpu.memory_space<vmem>>, vector<1x18x72xf32>
    %1 = vector.shape_cast %0 : vector<1x18x72xf32> to vector<18x72xf32>
    %2 = vector.extract_strided_slice %1 {offsets = [0, 0], sizes = [16, 72], strides = [1, 1]} : vector<18x72xf32> to vector<16x72xf32>
    %c0_2 = arith.constant 0 : index
    %c0_3 = arith.constant 0 : index
    %c0_4 = arith.constant 0 : index
    %3 = vector.load %arg2[%c0_2, %c0_3, %c0_4] : memref<3x72x144xf32, #tpu.memory_space<vmem>>, vector<1x72x144xf32>
    %4 = vector.shape_cast %3 : vector<1x72x144xf32> to vector<72x144xf32>
    %cst = arith.constant dense<0.000000e+00> : vector<16x144xf32>
    %5 = tpu.matmul %2, %4, %cst {dimension_numbers = #tpu.dot_dimension_numbers<[1], [0], [0], [1], [0, 0, 1, 1], [], []>} : vector<16x72xf32>, vector<72x144xf32>, vector<16x144xf32> -> vector<16x144xf32>
    %6 = vector.extract_strided_slice %1 {offsets = [1, 0], sizes = [16, 72], strides = [1, 1]} : vector<18x72xf32> to vector<16x72xf32>
    %c1 = arith.constant 1 : index
    %c0_5 = arith.constant 0 : index
    %c0_6 = arith.constant 0 : index
    %7 = vector.load %arg2[%c1, %c0_5, %c0_6] : memref<3x72x144xf32, #tpu.memory_space<vmem>>, vector<1x72x144xf32>
    %8 = vector.shape_cast %7 : vector<1x72x144xf32> to vector<72x144xf32>
    %cst_7 = arith.constant dense<0.000000e+00> : vector<16x144xf32>
    %9 = tpu.matmul %6, %8, %cst_7 {dimension_numbers = #tpu.dot_dimension_numbers<[1], [0], [0], [1], [0, 0, 1, 1], [], []>} : vector<16x72xf32>, vector<72x144xf32>, vector<16x144xf32> -> vector<16x144xf32>
    %10 = arith.addf %5, %9 : vector<16x144xf32>
    %11 = vector.extract_strided_slice %1 {offsets = [2, 0], sizes = [16, 72], strides = [1, 1]} : vector<18x72xf32> to vector<16x72xf32>
    %c2 = arith.constant 2 : index
    %c0_8 = arith.constant 0 : index
    %c0_9 = arith.constant 0 : index
    %12 = vector.load %arg2[%c2, %c0_8, %c0_9] : memref<3x72x144xf32, #tpu.memory_space<vmem>>, vector<1x72x144xf32>
    %13 = vector.shape_cast %12 : vector<1x72x144xf32> to vector<72x144xf32>
    %cst_10 = arith.constant dense<0.000000e+00> : vector<16x144xf32>
    %14 = tpu.matmul %11, %13, %cst_10 {dimension_numbers = #tpu.dot_dimension_numbers<[1], [0], [0], [1], [0, 0, 1, 1], [], []>} : vector<16x72xf32>, vector<72x144xf32>, vector<16x144xf32> -> vector<16x144xf32>
    %15 = arith.addf %10, %14 : vector<16x144xf32>
    %c0_11 = arith.constant 0 : index
    %c0_12 = arith.constant 0 : index
    %16 = vector.load %arg4[%c0_11, %c0_12] : memref<2x144xf32, #tpu.memory_space<vmem>>, vector<1x144xf32>
    %17 = vector.broadcast %16 : vector<1x144xf32> to vector<16x144xf32>
    %18 = arith.mulf %15, %17 : vector<16x144xf32>
    %c1_13 = arith.constant 1 : index
    %c0_14 = arith.constant 0 : index
    %19 = vector.load %arg4[%c1_13, %c0_14] : memref<2x144xf32, #tpu.memory_space<vmem>>, vector<1x144xf32>
    %20 = vector.broadcast %19 : vector<1x144xf32> to vector<16x144xf32>
    %21 = arith.addf %18, %20 : vector<16x144xf32>
    %cst_15 = arith.constant 0.000000e+00 : f32
    %22 = vector.broadcast %cst_15 : f32 to vector<16x144xf32>
    %23 = arith.maximumf %21, %22 : vector<16x144xf32>
    %cst_16 = arith.constant 0.000000e+00 : f32
    %24 = vector.broadcast %cst_16 : f32 to vector<1x144xf32>
    %c0_17 = arith.constant 0 : index
    %c0_18 = arith.constant 0 : index
    %25 = vector.load %arg7[%c0_17, %c0_18] : memref<18x144xf32, #tpu.memory_space<vmem>>, vector<1x144xf32>
    tpu.vector_store %arg7[%c0_17, %c0_18], %24 {strides = array<i32>} : memref<18x144xf32, #tpu.memory_space<vmem>>, vector<1x144xf32>,
    %c17 = arith.constant 17 : index
    %c0_19 = arith.constant 0 : index
    %26 = vector.load %arg7[%c17, %c0_19] : memref<18x144xf32, #tpu.memory_space<vmem>>, vector<1x144xf32>
    tpu.vector_store %arg7[%c17, %c0_19], %24 {strides = array<i32>} : memref<18x144xf32, #tpu.memory_space<vmem>>, vector<1x144xf32>,
    %c1_20 = arith.constant 1 : index
    %c0_21 = arith.constant 0 : index
    %27 = vector.load %arg7[%c1_20, %c0_21] : memref<18x144xf32, #tpu.memory_space<vmem>>, vector<16x144xf32>
    tpu.vector_store %arg7[%c1_20, %c0_21], %23 {strides = array<i32>} : memref<18x144xf32, #tpu.memory_space<vmem>>, vector<16x144xf32>,
    %c0_22 = arith.constant 0 : index
    %c0_23 = arith.constant 0 : index
    %28 = vector.load %arg7[%c0_22, %c0_23] : memref<18x144xf32, #tpu.memory_space<vmem>>, vector<16x144xf32>
    %c0_24 = arith.constant 0 : index
    %c0_25 = arith.constant 0 : index
    %c0_26 = arith.constant 0 : index
    %29 = vector.load %arg3[%c0_24, %c0_25, %c0_26] : memref<3x144x128xf32, #tpu.memory_space<vmem>>, vector<1x144x128xf32>
    %30 = vector.shape_cast %29 : vector<1x144x128xf32> to vector<144x128xf32>
    %cst_27 = arith.constant dense<0.000000e+00> : vector<16x128xf32>
    %31 = tpu.matmul %28, %30, %cst_27 {dimension_numbers = #tpu.dot_dimension_numbers<[1], [0], [0], [1], [0, 0, 1, 1], [], []>} : vector<16x144xf32>, vector<144x128xf32>, vector<16x128xf32> -> vector<16x128xf32>
    %c1_28 = arith.constant 1 : index
    %c0_29 = arith.constant 0 : index
    %32 = vector.load %arg7[%c1_28, %c0_29] : memref<18x144xf32, #tpu.memory_space<vmem>>, vector<16x144xf32>
    %c1_30 = arith.constant 1 : index
    %c0_31 = arith.constant 0 : index
    %c0_32 = arith.constant 0 : index
    %33 = vector.load %arg3[%c1_30, %c0_31, %c0_32] : memref<3x144x128xf32, #tpu.memory_space<vmem>>, vector<1x144x128xf32>
    %34 = vector.shape_cast %33 : vector<1x144x128xf32> to vector<144x128xf32>
    %cst_33 = arith.constant dense<0.000000e+00> : vector<16x128xf32>
    %35 = tpu.matmul %32, %34, %cst_33 {dimension_numbers = #tpu.dot_dimension_numbers<[1], [0], [0], [1], [0, 0, 1, 1], [], []>} : vector<16x144xf32>, vector<144x128xf32>, vector<16x128xf32> -> vector<16x128xf32>
    %36 = arith.addf %31, %35 : vector<16x128xf32>
    %c2_34 = arith.constant 2 : index
    %c0_35 = arith.constant 0 : index
    %37 = vector.load %arg7[%c2_34, %c0_35] : memref<18x144xf32, #tpu.memory_space<vmem>>, vector<16x144xf32>
    %c2_36 = arith.constant 2 : index
    %c0_37 = arith.constant 0 : index
    %c0_38 = arith.constant 0 : index
    %38 = vector.load %arg3[%c2_36, %c0_37, %c0_38] : memref<3x144x128xf32, #tpu.memory_space<vmem>>, vector<1x144x128xf32>
    %39 = vector.shape_cast %38 : vector<1x144x128xf32> to vector<144x128xf32>
    %cst_39 = arith.constant dense<0.000000e+00> : vector<16x128xf32>
    %40 = tpu.matmul %37, %39, %cst_39 {dimension_numbers = #tpu.dot_dimension_numbers<[1], [0], [0], [1], [0, 0, 1, 1], [], []>} : vector<16x144xf32>, vector<144x128xf32>, vector<16x128xf32> -> vector<16x128xf32>
    %41 = arith.addf %36, %40 : vector<16x128xf32>
    %c0_40 = arith.constant 0 : index
    %c0_41 = arith.constant 0 : index
    %42 = vector.load %arg5[%c0_40, %c0_41] : memref<2x128xf32, #tpu.memory_space<vmem>>, vector<1x128xf32>
    %43 = vector.broadcast %42 : vector<1x128xf32> to vector<16x128xf32>
    %44 = arith.mulf %41, %43 : vector<16x128xf32>
    %c1_42 = arith.constant 1 : index
    %c0_43 = arith.constant 0 : index
    %45 = vector.load %arg5[%c1_42, %c0_43] : memref<2x128xf32, #tpu.memory_space<vmem>>, vector<1x128xf32>
    %46 = vector.broadcast %45 : vector<1x128xf32> to vector<16x128xf32>
    %47 = arith.addf %44, %46 : vector<16x128xf32>
    %cst_44 = arith.constant 0.000000e+00 : f32
    %48 = vector.broadcast %cst_44 : f32 to vector<16x128xf32>
    %49 = arith.maximumf %47, %48 : vector<16x128xf32>
    %50 = vector.shape_cast %49 : vector<16x128xf32> to vector<1x16x128xf32>
    %c0_45 = arith.constant 0 : index
    %c0_46 = arith.constant 0 : index
    %c0_47 = arith.constant 0 : index
    %51 = vector.load %arg6[%c0_45, %c0_46, %c0_47] : memref<1x16x128xf32, #tpu.memory_space<vmem>>, vector<1x16x128xf32>
    tpu.vector_store %arg6[%c0_45, %c0_46, %c0_47], %50 {strides = array<i32>} : memref<1x16x128xf32, #tpu.memory_space<vmem>>, vector<1x16x128xf32>,
    return
  }
  func.func @transform_0(%arg0: i32) -> (i32, i32, i32) {
    %c0_i32 = arith.constant 0 : i32
    %c0_i32_0 = arith.constant 0 : i32
    %c0_i32_1 = arith.constant 0 : i32
    return %arg0, %c0_i32, %c0_i32_0 : i32, i32, i32
  }
  func.func @transform_1(%arg0: i32) -> (i32, i32, i32) {
    %c0_i32 = arith.constant 0 : i32
    %c0_i32_0 = arith.constant 0 : i32
    %c0_i32_1 = arith.constant 0 : i32
    %c0_i32_2 = arith.constant 0 : i32
    return %c0_i32, %c0_i32_0, %c0_i32_1 : i32, i32, i32
  }
  func.func @transform_2(%arg0: i32) -> (i32, i32, i32) {
    %c0_i32 = arith.constant 0 : i32
    %c0_i32_0 = arith.constant 0 : i32
    %c0_i32_1 = arith.constant 0 : i32
    %c0_i32_2 = arith.constant 0 : i32
    return %c0_i32, %c0_i32_0, %c0_i32_1 : i32, i32, i32
  }
  func.func @transform_3(%arg0: i32) -> (i32, i32) {
    %c0_i32 = arith.constant 0 : i32
    %c0_i32_0 = arith.constant 0 : i32
    %c0_i32_1 = arith.constant 0 : i32
    return %c0_i32, %c0_i32_0 : i32, i32
  }
  func.func @transform_4(%arg0: i32) -> (i32, i32) {
    %c0_i32 = arith.constant 0 : i32
    %c0_i32_0 = arith.constant 0 : i32
    %c0_i32_1 = arith.constant 0 : i32
    return %c0_i32, %c0_i32_0 : i32, i32
  }
  func.func @transform_5(%arg0: i32) -> (i32, i32, i32) {
    %c0_i32 = arith.constant 0 : i32
    %c0_i32_0 = arith.constant 0 : i32
    %c0_i32_1 = arith.constant 0 : i32
    return %arg0, %c0_i32, %c0_i32_0 : i32, i32, i32
  }
}

</mosaic_0001>

<bundles_post_ra>
// kernel: tile.23
= control target key start
LH: loop header
LB: loop body
LE: loop exit
PB: predicated region body
PF: predicated region fallthrough
CT: control target
= control target key end

     0   :  { %s28_s0 = inlined_call_operand.vmem [shape: f32[8], index: 0, kind: input, shape index: {}]   ;;  %s29_s1 = inlined_call_operand.vmem [shape: f32[16,8], index: 1, kind: output, shape index: {}]  }
   0x1   :  { %v4_v0 = vld [vmem:[%s28_s0] ss:$0 sm:$0xff] }
   0x2   :  { %5 = vst [vmem:[%s29_s1] sm:$0xff] %v4_v0  ;;  %8 = vst [vmem:[%s29_s1 + $0x8] sm:$0xff] %v4_v0 }

// kernel: tile.24
= control target key start
LH: loop header
LB: loop body
LE: loop exit
PB: predicated region body
PF: predicated region fallthrough
CT: control target
= control target key end

     0   :  { %s131_s10 = smov 120   ;;  %s132_s11 = smov 104   ;;  %vm3_vm0 = vcmask 64512   ;;  %vm9_vm1 = vcmask 1048512   ;;  %vm15_vm2 = vcmask 982912   ;;  %vm21_vm3 = vcmask 917312   ;;  %s207_s0 = inlined_call_operand.vmem [shape: f32[16,8], index: 0, kind: input, shape index: {}]   ;;  %s208_s1 = inlined_call_operand.vmem [shape: f32[128], index: 1, kind: output, shape index: {}]  }
   0x1   :  { %v101_v0 = vld [vmem:[%s207_s0 + $0xf] sm:$0x1]   ;;  %v103_v1 = vld [vmem:[%s207_s0 + $0xd] sm:$0x1]   ;;  %v102_v2 = vld [vmem:[%s207_s0 + $0xe] sm:$0x1]  }
   0x2   :  { %7 = vrot.lane.b32.xlu0 %v101_v0, %s131_s10  ;;  %19 = vrot.lane.b32.xlu1 %v103_v1, %s132_s11  ;;  %v104_v3 = vld [vmem:[%s207_s0 + $0xc] sm:$0x1]   ;;  %s133_s16 = smov 112   ;;  %s134_s17 = smov 96   ;;  %v105_v4 = vld [vmem:[%s207_s0 + $0xb] sm:$0x1]  }
   0x3   :  { %v106_v5 = vld [vmem:[%s207_s0 + $0xa] sm:$0x1]   ;;  %v2_v6 = vld [vmem:[%s207_s0] sm:$0x1]   ;;  %s135_s24 = smov 88   ;;  %s136_s25 = smov 80  }
   0x4   :  { %4 = vst.msk [vmem:[#allocation0] sm:$0x1] %vm3_vm0, %v2_v6   ;;  %v107_v7 = vld [vmem:[%s207_s0 + $0x9] sm:$0x1]   ;;  %v108_v8 = vld [vmem:[%s207_s0 + $0x8] sm:$0x1]  }
   0x5   :  { %s137_s30 = smov 72   ;;  %s138_s2 = smov 64   ;;  %v109_v9 = vld [vmem:[%s207_s0 + $0x7] sm:$0x1]   ;;  %v110_v10 = vld [vmem:[%s207_s0 + $0x6] sm:$0x1]  }
   0x6   :  { %13 = vrot.lane.b32.xlu0 %v102_v2, %s133_s16  ;;  %25 = vrot.lane.b32.xlu1 %v104_v3, %s134_s17  ;;  %s139_s7 = smov 56   ;;  %s140_s8 = smov 48   ;;  %v111_v11 = vld [vmem:[%s207_s0 + $0x5] sm:$0x1]   ;;  %v112_v12 = vld [vmem:[%s207_s0 + $0x4] sm:$0x1]  }
   0x7   :  { %s141_s13 = smov 40   ;;  %s142_s14 = smov 32   ;;  %v113_v13 = vld [vmem:[%s207_s0 + $0x3] sm:$0x1]   ;;  %v114_v14 = vld [vmem:[%s207_s0 + $0x2] sm:$0x1]  }
   0x8   :  { %s143_s19 = smov 24   ;;  %s144_s20 = smov 16   ;;  %v115_v15 = vld [vmem:[%s207_s0 + $0x1] sm:$0x1]   ;;  %vm27_vm4 = vcmask 851712   ;;  %vm33_vm5 = vcmask 786112  }
   0x9   :  { %s145_s0 = smov 8   ;;  %vm39_vm6 = vcmask 720512   ;;  %vm45_vm7 = vcmask 654912   ;;  %vm51_vm8 = vcmask 589312   ;;  %vm57_vm9 = vcmask 523712  }
   0xa   :  { %31 = vrot.lane.b32.xlu0 %v105_v4, %s135_s24  ;;  %37 = vrot.lane.b32.xlu1 %v106_v5, %s136_s25  ;;  %vm63_vm10 = vcmask 458112   ;;  %vm69_vm11 = vcmask 392512   ;;  %vm75_vm12 = vcmask 326912   ;;  %vm81_vm13 = vcmask 261312  }
   0xb   :  { %vm87_vm14 = vcmask 195712   ;;  %vm93_vm15 = vcmask 130112  }
   0xe   :  { %43 = vrot.lane.b32.xlu0 %v107_v7, %s137_s30  ;;  %49 = vrot.lane.b32.xlu1 %v108_v8, %s138_s2 }
  0x12   :  { %55 = vrot.lane.b32.xlu0 %v109_v9, %s139_s7  ;;  %61 = vrot.lane.b32.xlu1 %v110_v10, %s140_s8 }
  0x16   :  { %67 = vrot.lane.b32.xlu0 %v111_v11, %s141_s13  ;;  %73 = vrot.lane.b32.xlu1 %v112_v12, %s142_s14 }
  0x1a   :  { %79 = vrot.lane.b32.xlu0 %v113_v13, %s143_s19  ;;  %85 = vrot.lane.b32.xlu1 %v114_v14, %s144_s20 }
  0x1e   :  { %91 = vrot.lane.b32.xlu0 %v115_v15, %s145_s0 }
  0x74   :  { %v8_v16 = vpop.permute.xlu0 %7   ;;  %v20_v17 = vpop.permute.xlu1 %19  }
  0x75   :  { %10 = vst.msk [vmem:[#allocation0] sm:$0x1] %vm9_vm1, %v8_v16  }
  0x78   :  { %v14_v18 = vpop.permute.xlu0 %13   ;;  %v26_v19 = vpop.permute.xlu1 %25  }
  0x79   :  { %16 = vst.msk [vmem:[#allocation0] sm:$0x1] %vm15_vm2, %v14_v18  }
  0x7a   :  { %22 = vst.msk [vmem:[#allocation0] sm:$0x1] %vm21_vm3, %v20_v17  }
  0x7b   :  { %28 = vst.msk [vmem:[#allocation0] sm:$0x1] %vm27_vm4, %v26_v19  }
  0x7c   :  { %v32_v20 = vpop.permute.xlu0 %31   ;;  %v38_v21 = vpop.permute.xlu1 %37  }
  0x7d   :  { %34 = vst.msk [vmem:[#allocation0] sm:$0x1] %vm33_vm5, %v32_v20  }
  0x7e   :  { %40 = vst.msk [vmem:[#allocation0] sm:$0x1] %vm39_vm6, %v38_v21  }
  0x80   :  { %v44_v22 = vpop.permute.xlu0 %43   ;;  %v50_v23 = vpop.permute.xlu1 %49  }
  0x81   :  { %46 = vst.msk [vmem:[#allocation0] sm:$0x1] %vm45_vm7, %v44_v22  }
  0x82   :  { %52 = vst.msk [vmem:[#allocation0] sm:$0x1] %vm51_vm8, %v50_v23  }
  0x84   :  { %v56_v24 = vpop.permute.xlu0 %55   ;;  %v62_v25 = vpop.permute.xlu1 %61  }
  0x85   :  { %58 = vst.msk [vmem:[#allocation0] sm:$0x1] %vm57_vm9, %v56_v24  }
  0x86   :  { %64 = vst.msk [vmem:[#allocation0] sm:$0x1] %vm63_vm10, %v62_v25  }
  0x88   :  { %v68_v26 = vpop.permute.xlu0 %67   ;;  %v74_v27 = vpop.permute.xlu1 %73  }
  0x89   :  { %70 = vst.msk [vmem:[#allocation0] sm:$0x1] %vm69_vm11, %v68_v26  }
  0x8a   :  { %76 = vst.msk [vmem:[#allocation0] sm:$0x1] %vm75_vm12, %v74_v27  }
  0x8c   :  { %v80_v28 = vpop.permute.xlu0 %79   ;;  %v86_v29 = vpop.permute.xlu1 %85  }
  0x8d   :  { %82 = vst.msk [vmem:[#allocation0] sm:$0x1] %vm81_vm13, %v80_v28  }
  0x8e   :  { %88 = vst.msk [vmem:[#allocation0] sm:$0x1] %vm87_vm14, %v86_v29  }
  0x90   :  { %v92_v30 = vpop.permute.xlu0 %91  }
  0x91   :  { %94 = vst.msk [vmem:[#allocation0] sm:$0x1] %vm93_vm15, %v92_v30  }
  0x98   :  { %v98_v31 = vld [vmem:[#allocation0] sm:$0x1] }
  0x99   :  { %100 = vst [vmem:[%s208_s1] sm:$0x1] %v98_v31 }

// kernel: tile.38
= control target key start
LH: loop header
LB: loop body
LE: loop exit
PB: predicated region body
PF: predicated region fallthrough
CT: control target
= control target key end

     0   :  { %s131_s10 = smov 120   ;;  %s132_s11 = smov 104   ;;  %vm3_vm0 = vcmask 64512   ;;  %vm9_vm1 = vcmask 1048512   ;;  %vm15_vm2 = vcmask 982912   ;;  %vm21_vm3 = vcmask 917312   ;;  %s207_s0 = inlined_call_operand.vmem [shape: f32[16,8], index: 0, kind: input, shape index: {}]   ;;  %s208_s1 = inlined_call_operand.vmem [shape: f32[1,128], index: 1, kind: output, shape index: {}]  }
   0x1   :  { %v101_v0 = vld [vmem:[%s207_s0 + $0xf] sm:$0x1]   ;;  %v103_v1 = vld [vmem:[%s207_s0 + $0xd] sm:$0x1]   ;;  %v102_v2 = vld [vmem:[%s207_s0 + $0xe] sm:$0x1]  }
   0x2   :  { %7 = vrot.lane.b32.xlu0 %v101_v0, %s131_s10  ;;  %19 = vrot.lane.b32.xlu1 %v103_v1, %s132_s11  ;;  %v104_v3 = vld [vmem:[%s207_s0 + $0xc] sm:$0x1]   ;;  %s133_s16 = smov 112   ;;  %s134_s17 = smov 96   ;;  %v105_v4 = vld [vmem:[%s207_s0 + $0xb] sm:$0x1]  }
   0x3   :  { %v106_v5 = vld [vmem:[%s207_s0 + $0xa] sm:$0x1]   ;;  %v2_v6 = vld [vmem:[%s207_s0] sm:$0x1]   ;;  %s135_s24 = smov 88   ;;  %s136_s25 = smov 80  }
   0x4   :  { %4 = vst.msk [vmem:[#allocation0] sm:$0x1] %vm3_vm0, %v2_v6   ;;  %v107_v7 = vld [vmem:[%s207_s0 + $0x9] sm:$0x1]   ;;  %v108_v8 = vld [vmem:[%s207_s0 + $0x8] sm:$0x1]  }
   0x5   :  { %s137_s30 = smov 72   ;;  %s138_s2 = smov 64   ;;  %v109_v9 = vld [vmem:[%s207_s0 + $0x7] sm:$0x1]   ;;  %v110_v10 = vld [vmem:[%s207_s0 + $0x6] sm:$0x1]  }
   0x6   :  { %13 = vrot.lane.b32.xlu0 %v102_v2, %s133_s16  ;;  %25 = vrot.lane.b32.xlu1 %v104_v3, %s134_s17  ;;  %s139_s7 = smov 56   ;;  %s140_s8 = smov 48   ;;  %v111_v11 = vld [vmem:[%s207_s0 + $0x5] sm:$0x1]   ;;  %v112_v12 = vld [vmem:[%s207_s0 + $0x4] sm:$0x1]  }
   0x7   :  { %s141_s13 = smov 40   ;;  %s142_s14 = smov 32   ;;  %v113_v13 = vld [vmem:[%s207_s0 + $0x3] sm:$0x1]   ;;  %v114_v14 = vld [vmem:[%s207_s0 + $0x2] sm:$0x1]  }
   0x8   :  { %s143_s19 = smov 24   ;;  %s144_s20 = smov 16   ;;  %v115_v15 = vld [vmem:[%s207_s0 + $0x1] sm:$0x1]   ;;  %vm27_vm4 = vcmask 851712   ;;  %vm33_vm5 = vcmask 786112  }
   0x9   :  { %s145_s0 = smov 8   ;;  %vm39_vm6 = vcmask 720512   ;;  %vm45_vm7 = vcmask 654912   ;;  %vm51_vm8 = vcmask 589312   ;;  %vm57_vm9 = vcmask 523712  }
   0xa   :  { %31 = vrot.lane.b32.xlu0 %v105_v4, %s135_s24  ;;  %37 = vrot.lane.b32.xlu1 %v106_v5, %s136_s25  ;;  %vm63_vm10 = vcmask 458112   ;;  %vm69_vm11 = vcmask 392512   ;;  %vm75_vm12 = vcmask 326912   ;;  %vm81_vm13 = vcmask 261312  }
   0xb   :  { %vm87_vm14 = vcmask 195712   ;;  %vm93_vm15 = vcmask 130112  }
   0xe   :  { %43 = vrot.lane.b32.xlu0 %v107_v7, %s137_s30  ;;  %49 = vrot.lane.b32.xlu1 %v108_v8, %s138_s2 }
  0x12   :  { %55 = vrot.lane.b32.xlu0 %v109_v9, %s139_s7  ;;  %61 = vrot.lane.b32.xlu1 %v110_v10, %s140_s8 }
  0x16   :  { %67 = vrot.lane.b32.xlu0 %v111_v11, %s141_s13  ;;  %73 = vrot.lane.b32.xlu1 %v112_v12, %s142_s14 }
  0x1a   :  { %79 = vrot.lane.b32.xlu0 %v113_v13, %s143_s19  ;;  %85 = vrot.lane.b32.xlu1 %v114_v14, %s144_s20 }
  0x1e   :  { %91 = vrot.lane.b32.xlu0 %v115_v15, %s145_s0 }
  0x74   :  { %v8_v16 = vpop.permute.xlu0 %7   ;;  %v20_v17 = vpop.permute.xlu1 %19  }
  0x75   :  { %10 = vst.msk [vmem:[#allocation0] sm:$0x1] %vm9_vm1, %v8_v16  }
  0x78   :  { %v14_v18 = vpop.permute.xlu0 %13   ;;  %v26_v19 = vpop.permute.xlu1 %25  }
  0x79   :  { %16 = vst.msk [vmem:[#allocation0] sm:$0x1] %vm15_vm2, %v14_v18  }
  0x7a   :  { %22 = vst.msk [vmem:[#allocation0] sm:$0x1] %vm21_vm3, %v20_v17  }
  0x7b   :  { %28 = vst.msk [vmem:[#allocation0] sm:$0x1] %vm27_vm4, %v26_v19  }
  0x7c   :  { %v32_v20 = vpop.permute.xlu0 %31   ;;  %v38_v21 = vpop.permute.xlu1 %37  }
  0x7d   :  { %34 = vst.msk [vmem:[#allocation0] sm:$0x1] %vm33_vm5, %v32_v20  }
  0x7e   :  { %40 = vst.msk [vmem:[#allocation0] sm:$0x1] %vm39_vm6, %v38_v21  }
  0x80   :  { %v44_v22 = vpop.permute.xlu0 %43   ;;  %v50_v23 = vpop.permute.xlu1 %49  }
  0x81   :  { %46 = vst.msk [vmem:[#allocation0] sm:$0x1] %vm45_vm7, %v44_v22  }
  0x82   :  { %52 = vst.msk [vmem:[#allocation0] sm:$0x1] %vm51_vm8, %v50_v23  }
  0x84   :  { %v56_v24 = vpop.permute.xlu0 %55   ;;  %v62_v25 = vpop.permute.xlu1 %61  }
  0x85   :  { %58 = vst.msk [vmem:[#allocation0] sm:$0x1] %vm57_vm9, %v56_v24  }
  0x86   :  { %64 = vst.msk [vmem:[#allocation0] sm:$0x1] %vm63_vm10, %v62_v25  }
  0x88   :  { %v68_v26 = vpop.permute.xlu0 %67   ;;  %v74_v27 = vpop.permute.xlu1 %73  }
  0x89   :  { %70 = vst.msk [vmem:[#allocation0] sm:$0x1] %vm69_vm11, %v68_v26  }
  0x8a   :  { %76 = vst.msk [vmem:[#allocation0] sm:$0x1] %vm75_vm12, %v74_v27  }
  0x8c   :  { %v80_v28 = vpop.permute.xlu0 %79   ;;  %v86_v29 = vpop.permute.xlu1 %85  }
  0x8d   :  { %82 = vst.msk [vmem:[#allocation0] sm:$0x1] %vm81_vm13, %v80_v28  }
  0x8e   :  { %88 = vst.msk [vmem:[#allocation0] sm:$0x1] %vm87_vm14, %v86_v29  }
  0x90   :  { %v92_v30 = vpop.permute.xlu0 %91  }
  0x91   :  { %94 = vst.msk [vmem:[#allocation0] sm:$0x1] %vm93_vm15, %v92_v30  }
  0x98   :  { %v98_v31 = vld [vmem:[#allocation0] sm:$0x1] }
  0x99   :  { %100 = vst [vmem:[%s208_s1] sm:$0x1] %v98_v31 }

// kernel: double_conv_forward.1
= control target key start
LH: loop header
LB: loop body
LE: loop exit
PB: predicated region body
PF: predicated region fallthrough
CT: control target
= control target key end

     0   :  { %s1326_s18 = smov 0   ;;  %s1767_s0 = inlined_call_operand.vmem [shape: f32[2,18,72], index: 0, kind: input, shape index: {}]   ;;  %s1768_s1 = inlined_call_operand.vmem [shape: f32[3,72,144], index: 1, kind: input, shape index: {}]   ;;  %s1769_s2 = inlined_call_operand.vmem [shape: f32[3,144,128], index: 2, kind: input, shape index: {}]   ;;  %s1770_s3 = inlined_call_operand.vmem [shape: f32[2,144], index: 3, kind: input, shape index: {}]   ;;  %s1771_s4 = inlined_call_operand.vmem [shape: f32[2,128], index: 4, kind: input, shape index: {}]   ;;  %s1772_s5 = inlined_call_operand.vmem [shape: f32[2,16,128], index: 5, kind: output, shape index: {}]  }
   0x1 LB: > { %s1034_s19 = sadd.s32 4294967295, %s1292_s18   ;;  %p1038_p0 = scmp.ge.s32.totalorder %s1292_s18, 1  ;;  %s1292_s18 = sphi %s1326_s18, %s15_s18  }
   0x2   : > { %p187_p1 = scmp.lt.s32.totalorder %s1292_s18, 3 }
   0x4   : > { %p188_p2 = pnand %p1038_p0, %p187_p1 }
   0x5   : > { %v1043_v0 = vld [vmem:[%s1768_s1 + $0x98] sm:$0xff] (!%p188_p2)  ;;  %v1045_v1 = vld [vmem:[%s1768_s1 + $0xa8] sm:$0xff] (!%p188_p2)  ;;  %v1042_v2 = vld [vmem:[%s1768_s1 + $0x90] sm:$0xff] (!%p188_p2)  ;;  %p215_p3 = scmp.lt.s32.totalorder (!%p188_p2), %s1034_s19, 1  ;;  %v1294_v7 = vmov (!%p188_p2), 0.0   ;;  %v1295_v13 = vmov (!%p188_p2), 0.0|0.0  }
   0x6   : > { %191 = sbr.rel (%p188_p2) target bundleno = 553 (0x229), region = 40  ;;  %v1132_v3 = vpack.c.bf16 (!%p188_p2), %v1045_v1, %v1043_v0  ;;  %v1044_v4 = vld [vmem:[%s1768_s1 + $0xa0] sm:$0xff] (!%p188_p2)  ;;  %v1047_v5 = vld [vmem:[%s1768_s1 + $0xb8] sm:$0xff] (!%p188_p2)  ;;  %v1049_v6 = vld [vmem:[%s1768_s1 + $0xc8] sm:$0xff] (!%p188_p2)  ;;  %343 = vmatprep.mubr.f32.mxu0 (!%p188_p2), %v1294_v7  ;;  %1207 = vmatprep.subr.bf16.mxu1 (!%p188_p2), %v1295_v13  ;;  %vm268_vm0 = vcmask (!%p188_p2), 1046528   ;;  %vm274_vm1 = vcmask (!%p188_p2), 588800  }
   0x7   : > { %v1134_v8 = vpack.c.bf16 (!%p188_p2), %v1044_v4, %v1042_v2  ;;  %v1136_v9 = vpack.c.bf16 (!%p188_p2), %v1049_v6, %v1047_v5  ;;  %v1046_v10 = vld [vmem:[%s1768_s1 + $0xb0] sm:$0xff] (!%p188_p2)  ;;  %v1048_v11 = vld [vmem:[%s1768_s1 + $0xc0] sm:$0xff] (!%p188_p2)  ;;  %v1051_v12 = vld [vmem:[%s1768_s1 + $0xd8] sm:$0xff] (!%p188_p2)  ;;  %vm456_vm2 = vcmask (!%p188_p2), 1045504   ;;  %vm611_vm4 = vcmask (!%p188_p2), 130049  }
   0x8   : > { %1133 = vmatprep.subr.bf16.mxu0 (!%p188_p2), %v1132_v3  ;;  %v1053_v14 = vld [vmem:[%s1768_s1 + $0xe8] sm:$0xff] (!%p188_p2)  ;;  %v1138_v15 = vpack.c.bf16 (!%p188_p2), %v1048_v11, %v1046_v10  ;;  %v1050_v17 = vld [vmem:[%s1768_s1 + $0xd0] sm:$0xff] (!%p188_p2)  ;;  %v1052_v18 = vld [vmem:[%s1768_s1 + $0xe0] sm:$0xff] (!%p188_p2)  ;;  %vm597_vm5 = vcmask (!%p188_p2), 1040384   ;;  %vm617_vm6 = vcmask (!%p188_p2), 122880   ;;  %vm614_vm7 = vcmask (!%p188_p2), 130048  }
   0x9   : > { %1135 = vmatpush1.bf16.msra.mxu0 (!%p188_p2), %v1134_v8  ;;  %v1140_v16 = vpack.c.bf16 (!%p188_p2), %v1053_v14, %v1051_v12  ;;  %v1055_v19 = vld [vmem:[%s1768_s1 + $0xf8] sm:$0xff] (!%p188_p2)  ;;  %v1057_v20 = vld [vmem:[%s1768_s1 + $0x108] sm:$0xff] (!%p188_p2)  ;;  %v1142_v21 = vpack.c.bf16 (!%p188_p2), %v1052_v18, %v1050_v17  ;;  %v1054_v23 = vld [vmem:[%s1768_s1 + $0xf0] sm:$0xff] (!%p188_p2) }
   0xa   : > { %1137 = vmatprep.subr.bf16.mxu0 (!%p188_p2), %v1136_v9  ;;  %v1144_v22 = vpack.c.bf16 (!%p188_p2), %v1057_v20, %v1055_v19  ;;  %v1056_v24 = vld [vmem:[%s1768_s1 + $0x100] sm:$0xff] (!%p188_p2)  ;;  %v1059_v28 = vld [vmem:[%s1768_s1 + $0x118] sm:$0xff] (!%p188_p2)  ;;  %v229_v29 = vld [vmem:[%s1768_s1 + $0x8] sm:$0xff] (!%p188_p2) }
   0xb   : > { %v1146_v27 = vpack.c.bf16 (!%p188_p2), %v1056_v24, %v1054_v23  ;;  %v231_v30 = vld [vmem:[%s1768_s1 + $0x18] sm:$0xff] (!%p188_p2)  ;;  %v228_v33 = vld [vmem:[%s1768_s1] sm:$0xff] (!%p188_p2)  ;;  %v230_v34 = vld [vmem:[%s1768_s1 + $0x10] sm:$0xff] (!%p188_p2) }
   0xc   : > { %v233_v36 = vld [vmem:[%s1768_s1 + $0x28] sm:$0xff] (!%p188_p2)  ;;  %v235_v37 = vld [vmem:[%s1768_s1 + $0x38] sm:$0xff] (!%p188_p2)  ;;  %v1058_v38 = vld [vmem:[%s1768_s1 + $0x110] sm:$0xff] (!%p188_p2)  ;;  %v1148_v39 = vpack.c.bf16 (!%p188_p2), %v231_v30, %v229_v29  ;;  %v1150_v41 = vpack.c.bf16 (!%p188_p2), %v230_v34, %v228_v33 }
   0xd   : > { %s1774_s19 = smov (!%p215_p3, %s1034_s19), 1  ;;  %1139 = vmatpush1.bf16.msra.mxu0 %v1138_v15  ;;  %v232_v42 = vld [vmem:[%s1768_s1 + $0x20] sm:$0xff]  ;;  %v234_v43 = vld [vmem:[%s1768_s1 + $0x30] sm:$0xff]  ;;  %v1152_v45 = vpack.c.bf16 %v235_v37, %v233_v36  ;;  %v237_v46 = vld [vmem:[%s1768_s1 + $0x48] sm:$0xff] }
   0xe   : > { %s1275_s15 = smul.u32 24, %s1774_s19  ;;  %1141 = vmatprep.subr.bf16.mxu0 %v1140_v16  ;;  %v623_v47 = vld [vmem:[%s1769_s2] sm:$0xff]  ;;  %v624_v48 = vld [vmem:[%s1769_s2 + $0x8] sm:$0xff]  ;;  %v239_v49 = vld [vmem:[%s1768_s1 + $0x58] sm:$0xff]  ;;  %v1154_v53 = vpack.c.bf16 %v234_v43, %v232_v42  ;;  %s1131_s16 = sshll.u32 %s1774_s19, 4 }
   0xf   : > { %v1208_v50 = vpack.c.bf16 %v624_v48, %v623_v47  ;;  %v625_v51 = vld [vmem:[%s1769_s2 + $0x10] sm:$0xff]  ;;  %v626_v52 = vld [vmem:[%s1769_s2 + $0x18] sm:$0xff]  ;;  %v1156_v55 = vpack.c.bf16 %v239_v49, %v237_v46  ;;  %v236_v56 = vld [vmem:[%s1768_s1 + $0x40] sm:$0xff]  ;;  %s224_s21 = scalar_lea.vmem %s1772_s5, %s1131_s16 }
  0x10   : > { %s219_s28 = scalar_lea.vmem %s1767_s0, %s1275_s15  ;;  %v238_v57 = vld [vmem:[%s1768_s1 + $0x50] sm:$0xff]  ;;  %v241_v58 = vld [vmem:[%s1768_s1 + $0x68] sm:$0xff]  ;;  %v1211_v59 = vpack.c.bf16 %v626_v52, %v625_v51  ;;  %v243_v60 = vld [vmem:[%s1768_s1 + $0x78] sm:$0xff] }
  0x11   : > { %v1390_v25 = vld [vmem:[%s219_s28] sm:$0xff]  ;;  %v1392_v26 = vld [vmem:[%s219_s28 + $0x8] sm:$0xff]  ;;  %1143 = vmatpush1.bf16.msra.mxu0 %v1142_v21  ;;  %v1411_v35 = vld [vmem:[%s219_s28 + $0x10] sm:$0x3]  ;;  %1209 = vmatpush1.bf16.msra.mxu1 %v1208_v50  ;;  %v1158_v63 = vpack.c.bf16 %v238_v57, %v236_v56  ;;  %v1160_v0 = vpack.c.bf16 %v243_v60, %v241_v58 }
  0x12   : > { %1145 = vmatprep.subr.bf16.mxu0 %v1144_v22  ;;  %v269_v31 = vrot.slane %v1390_v25, 1  ;;  %v270_v32 = vrot.slane %v1392_v26, 1  ;;  %v272_v44 = vrot.slane %v1411_v35, 1  ;;  %1210 = vmatprep.subr.bf16.mxu1 %v1295_v13  ;;  %v627_v61 = vld [vmem:[%s1769_s2 + $0x20] sm:$0xff]  ;;  %v628_v62 = vld [vmem:[%s1769_s2 + $0x28] sm:$0xff]  ;;  %v242_v2 = vld [vmem:[%s1768_s1 + $0x70] sm:$0xff] }
  0x13   : > { %v240_v1 = vld [vmem:[%s1768_s1 + $0x60] sm:$0xff]  ;;  %v1214_v3 = vpack.c.bf16 %v628_v62, %v627_v61  ;;  %v629_v4 = vld [vmem:[%s1769_s2 + $0x30] sm:$0xff]  ;;  %v630_v5 = vld [vmem:[%s1769_s2 + $0x38] sm:$0xff]  ;;  %v457_v42 = vrot.slane %v1390_v25, 2  ;;  %v458_v43 = vrot.slane %v1392_v26, 2  ;;  %v460_v47 = vrot.slane %v1411_v35, 2 }
  0x14   : > { %v271_v40 = vsel %vm268_vm0, %v269_v31, %v270_v32  ;;  %v273_v54 = vsel %vm268_vm0, %v270_v32, %v272_v44  ;;  %v1162_v6 = vpack.c.bf16 %v242_v2, %v240_v1  ;;  %v1217_v8 = vpack.c.bf16 %v630_v5, %v629_v4  ;;  %v245_v9 = vld [vmem:[%s1768_s1 + $0x88] sm:$0xff]  ;;  %v1067_v11 = vld [vmem:[%s1768_s1 + $0x138] sm:$0xff]  ;;  %v1064_v12 = vld [vmem:[%s1768_s1 + $0x120] sm:$0xff] }
  0x15   : > { %1147 = vmatpush1.bf16.msra.mxu0 %v1146_v27  ;;  %1212 = vmatpush1.bf16.msra.mxu1 %v1211_v59  ;;  %v1065_v10 = vld [vmem:[%s1768_s1 + $0x128] sm:$0xff]  ;;  %v1066_v14 = vld [vmem:[%s1768_s1 + $0x130] sm:$0xff]  ;;  %v1071_v16 = vld [vmem:[%s1768_s1 + $0x158] sm:$0xff]  ;;  %v461_v51 = vsel %vm456_vm2, %v458_v43, %v460_v47  ;;  %v549_v61 = vlaneseq }
  0x16   : > { %295 = vmatprep.subr.mxu0 %v1059_v28  ;;  %1213 = vmatprep.subr.bf16.mxu1 %v1295_v13  ;;  %v1069_v15 = vld [vmem:[%s1768_s1 + $0x148] sm:$0xff]  ;;  %v631_v17 = vld [vmem:[%s1769_s2 + $0x40] sm:$0xff]  ;;  %v1164_v20 = vpack.c.bf16 %v1067_v11, %v1065_v10  ;;  %v1166_v21 = vpack.c.bf16 %v1066_v14, %v1064_v12  ;;  %v1070_v24 = vld [vmem:[%s1768_s1 + $0x150] sm:$0xff] }
  0x17   : > { %v632_v18 = vld [vmem:[%s1769_s2 + $0x48] sm:$0xff]  ;;  %v244_v19 = vld [vmem:[%s1768_s1 + $0x80] sm:$0xff]  ;;  %v1168_v22 = vpack.c.bf16 %v1071_v16, %v1069_v15  ;;  %v1075_v29 = vld [vmem:[%s1768_s1 + $0x178] sm:$0xff]  ;;  %vm586_vm3 = vcmp.lt.s32.totalorder %v549_v61, 144 }
  0x18   : > { %v1068_v23 = vld [vmem:[%s1768_s1 + $0x140] sm:$0xff]  ;;  %v1220_v27 = vpack.c.bf16 %v632_v18, %v631_v17  ;;  %v1073_v28 = vld [vmem:[%s1768_s1 + $0x168] sm:$0xff]  ;;  %v1074_v33 = vld [vmem:[%s1768_s1 + $0x170] sm:$0xff]  ;;  %588 = vst.msk [vmem:[#allocation2] ss:$8 sm:$0x3] %vm586_vm3, %v1294_v7 }
  0x19   : > { %296 = vmatpush1.msra.mxu0 %v1058_v38  ;;  %1215 = vmatpush1.bf16.msra.mxu1 %v1214_v3  ;;  %v1170_v30 = vpack.c.bf16 %v1070_v24, %v1068_v23  ;;  %v1172_v31 = vpack.c.bf16 %v1075_v29, %v1073_v28  ;;  %v1072_v32 = vld [vmem:[%s1768_s1 + $0x160] sm:$0xff]  ;;  %v1077_v34 = vld [vmem:[%s1768_s1 + $0x188] sm:$0xff]  ;;  %v1079_v36 = vld [vmem:[%s1768_s1 + $0x198] sm:$0xff]  ;;  %591 = vst.msk [vmem:[#allocation2 + $0x21] ss:$8 sm:$0x3] %vm586_vm3, %v1294_v7 }
  0x1a   : > { %1149 = vmatprep.subr.bf16.mxu0 %v1148_v39  ;;  %1060 = vmatmul.mubr.msk.f32.vlgmr.msra.gmra.mrb[0].mxu0 %vm274_vm1, %v271_v40  ;;  %v1174_v37 = vpack.c.bf16 %v1074_v33, %v1072_v32  ;;  %v1176_v38 = vpack.c.bf16 %v1079_v36, %v1077_v34  ;;  %v1076_v39 = vld [vmem:[%s1768_s1 + $0x180] sm:$0xff]  ;;  %v1078_v40 = vld [vmem:[%s1768_s1 + $0x190] sm:$0xff]  ;;  %v1081_v44 = vld [vmem:[%s1768_s1 + $0x1a8] sm:$0xff]  ;;  %v550_v23 = vshrl.u32 %v549_v61, 7 }
  0x1b   : > { %1151 = vmatpush1.bf16.msra.mxu0 %v1150_v41  ;;  %349 = vmatprep.mubr.f32.mxu0 %v1294_v7  ;;  %v1178_v41 = vpack.c.bf16 %v1078_v40, %v1076_v39  ;;  %v1086_v46 = vld [vmem:[%s1769_s2 + $0x98] sm:$0xff]  ;;  %v1087_v49 = vld [vmem:[%s1769_s2 + $0xa0] sm:$0xff]  ;;  %v1088_v50 = vld [vmem:[%s1769_s2 + $0xa8] sm:$0xff] }
  0x1c   : > { %1153 = vmatprep.subr.bf16.mxu0 %v1152_v45  ;;  %1216 = vmatprep.subr.bf16.mxu1 %v1295_v13  ;;  %v1085_v45 = vld [vmem:[%s1769_s2 + $0x90] sm:$0xff]  ;;  %v1184_v35 = vpack.c.bf16 %v1088_v50, %v1087_v49  ;;  %v634_v56 = vld [vmem:[%s1769_s2 + $0x58] sm:$0xff]  ;;  %v1091_v58 = vld [vmem:[%s1769_s2 + $0xc0] sm:$0xff]  ;;  %v551_v24 = vsub.s32 0, %v550_v23  ;;  %v555_v28 = vsub.s32 1, %v550_v23 }
  0x1d   : > { %1218 = vmatpush1.bf16.msra.mxu1 %v1217_v8  ;;  %v1181_v48 = vpack.c.bf16 %v1086_v46, %v1085_v45  ;;  %v1089_v52 = vld [vmem:[%s1769_s2 + $0xb0] sm:$0xff]  ;;  %v1092_v59 = vld [vmem:[%s1769_s2 + $0xc8] sm:$0xff]  ;;  %v635_v62 = vld [vmem:[%s1769_s2 + $0x60] sm:$0xff] }
  0x1e   : > { %1061 = vmatmul.mubr.msk.f32.gmra.mrb[2].mxu0 %vm274_vm1, %v273_v54  ;;  %1219 = vmatprep.subr.bf16.mxu1 %v1295_v13  ;;  %v1190_v60 = vpack.c.bf16 %v1092_v59, %v1091_v58  ;;  %v1093_v1 = vld [vmem:[%s1769_s2 + $0xd0] sm:$0xff]  ;;  %v1094_v2 = vld [vmem:[%s1769_s2 + $0xd8] sm:$0xff]  ;;  %v1096_v8 = vld [vmem:[%s1769_s2 + $0xe8] sm:$0xff] }
  0x1f   : > { %1155 = vmatpush1.bf16.msra.mxu0 %v1154_v53  ;;  %424 = vmatprep.mubr.f32.mxu0 %v1294_v7  ;;  %v1090_v53 = vld [vmem:[%s1769_s2 + $0xb8] sm:$0xff]  ;;  %v1193_v3 = vpack.c.bf16 %v1094_v2, %v1093_v1  ;;  %v637_v4 = vld [vmem:[%s1769_s2 + $0x70] sm:$0xff]  ;;  %v639_v10 = vld [vmem:[%s1769_s2 + $0x80] sm:$0xff] }
  0x20   : > { %1157 = vmatprep.subr.bf16.mxu0 %v1156_v55  ;;  %v1187_v54 = vpack.c.bf16 %v1090_v53, %v1089_v52  ;;  %v633_v55 = vld [vmem:[%s1769_s2 + $0x50] sm:$0xff]  ;;  %v638_v5 = vld [vmem:[%s1769_s2 + $0x78] sm:$0xff]  ;;  %v640_v11 = vld [vmem:[%s1769_s2 + $0x88] sm:$0xff] }
  0x21   : > { %1221 = vmatpush1.bf16.msra.mxu1 %v1220_v27  ;;  %v1223_v57 = vpack.c.bf16 %v634_v56, %v633_v55  ;;  %v1232_v12 = vpack.c.bf16 %v640_v11, %v639_v10  ;;  %v1097_v14 = vld [vmem:[%s1769_s2 + $0xf0] sm:$0xff]  ;;  %v1098_v15 = vld [vmem:[%s1769_s2 + $0xf8] sm:$0xff]  ;;  %v1099_v17 = vld [vmem:[%s1769_s2 + $0x100] sm:$0xff] }
  0x22   : > { %1222 = vmatprep.subr.bf16.mxu1 %v1295_v13  ;;  %v1199_v16 = vpack.c.bf16 %v1098_v15, %v1097_v14  ;;  %v1100_v18 = vld [vmem:[%s1769_s2 + $0x108] sm:$0xff]  ;;  %v547_v27 = vld [vmem:[%s1770_s3] ss:$2 sm:$0x3]  ;;  %v1109_v58 = vld [vmem:[%s1769_s2 + $0x130] sm:$0xff] }
  0x23   : > { %1159 = vmatpush1.bf16.msra.mxu0 %v1158_v63  ;;  %v636_v63 = vld [vmem:[%s1769_s2 + $0x68] sm:$0xff]  ;;  %v1084_v29 = vld [vmem:[%s1770_s3 + $0x1] ss:$2 sm:$0x3]  ;;  %v1110_v59 = vld [vmem:[%s1769_s2 + $0x138] sm:$0xff] }
  0x24   : > { %1161 = vmatprep.subr.bf16.mxu0 %v1160_v0  ;;  %v1226_v0 = vpack.c.bf16 %v636_v63, %v635_v62  ;;  %v569_v32 = vrot.slane %v1084_v29, %v551_v24  ;;  %v573_v34 = vrot.slane %v1084_v29, %v555_v28  ;;  %v1107_v53 = vld [vmem:[%s1769_s2 + $0x120] sm:$0xff]  ;;  %v1238_v63 = vpack.c.bf16 %v1110_v59, %v1109_v58  ;;  %v1112_v2 = vld [vmem:[%s1769_s2 + $0x148] sm:$0xff]  ;;  %v1117_v29 = vld [vmem:[%s1769_s2 + $0x170] sm:$0xff] }
  0x25   : > { %1224 = vmatpush1.bf16.msra.mxu1 %v1223_v57  ;;  %v1111_v1 = vld [vmem:[%s1769_s2 + $0x140] sm:$0xff] }
  0x26   : > { %1225 = vmatprep.subr.bf16.mxu1 %v1295_v13  ;;  %v1241_v14 = vpack.c.bf16 %v1112_v2, %v1111_v1  ;;  %v1115_v23 = vld [vmem:[%s1769_s2 + $0x160] sm:$0xff] }
  0x27   : > { %1163 = vmatpush1.bf16.msra.mxu0 %v1162_v6  ;;  %v1229_v6 = vpack.c.bf16 %v638_v5, %v637_v4 }
  0x28   : > { %376 = vmatprep.subr.mxu0 %v245_v9 }
  0x29   : > { %1227 = vmatpush1.bf16.msra.mxu1 %v1226_v0 }
  0x2a   : > { %1228 = vmatprep.subr.bf16.mxu1 %v1295_v13 }
  0x2b   : > { %377 = vmatpush1.msra.mxu0 %v244_v19  ;;  %v1202_v19 = vpack.c.bf16 %v1100_v18, %v1099_v17  ;;  %v1113_v17 = vld [vmem:[%s1769_s2 + $0x150] sm:$0xff]  ;;  %v1114_v18 = vld [vmem:[%s1769_s2 + $0x158] sm:$0xff] }
  0x2c   : > { %1165 = vmatprep.subr.bf16.mxu0 %v1164_v20  ;;  %1062 = vmatmul.mubr.msk.f32.vlgmr.msra.gmra.mrb[0].mxu0 %vm274_vm1, %v1390_v25  ;;  %v1080_v25 = vld [vmem:[%s1768_s1 + $0x1a0] sm:$0xff]  ;;  %v1101_v20 = vld [vmem:[%s1769_s2 + $0x110] sm:$0xff] }
  0x2d   : > { %1167 = vmatpush1.bf16.msra.mxu0 %v1166_v21  ;;  %430 = vmatprep.mubr.f32.mxu0 %v1294_v7  ;;  %v1102_v21 = vld [vmem:[%s1769_s2 + $0x118] sm:$0xff] }
  0x2e   : > { %1169 = vmatprep.subr.bf16.mxu0 %v1168_v22  ;;  %1230 = vmatpush1.bf16.msra.mxu1 %v1229_v6  ;;  %v1205_v22 = vpack.c.bf16 %v1102_v21, %v1101_v20 }
  0x2f   : > { %1231 = vmatprep.subr.bf16.mxu1 %v1295_v13 }
  0x30   : > { %1063 = vmatmul.mubr.msk.f32.gmra.mrb[2].mxu0 %vm274_vm1, %v1392_v26  ;;  %v459_v26 = vsel %vm456_vm2, %v457_v42, %v458_v43 }
  0x31   : > { %1171 = vmatpush1.bf16.msra.mxu0 %v1170_v30  ;;  %530 = vmatprep.mubr.f32.mxu0 %v1294_v7  ;;  %v552_v30 = vrot.slane %v547_v27, %v551_v24  ;;  %v1116_v24 = vld [vmem:[%s1769_s2 + $0x168] sm:$0xff] }
  0x32   : > { %1173 = vmatprep.subr.bf16.mxu0 %v1172_v31  ;;  %1233 = vmatpush1.bf16.msra.mxu1 %v1232_v12  ;;  %v556_v31 = vrot.slane %v547_v27, %v555_v28  ;;  %v1247_v28 = vpack.c.bf16 %v1116_v24, %v1115_v23 }
  0x33   : > { %1234 = vmatprep.subr.bf16.mxu1 %v1295_v13 }
  0x35   : > { %1175 = vmatpush1.bf16.msra.mxu0 %v1174_v37 }
  0x36   : > { %1177 = vmatprep.subr.bf16.mxu0 %v1176_v38 }
  0x39   : > { %1179 = vmatpush1.bf16.msra.mxu0 %v1178_v41 }
  0x3a   : > { %482 = vmatprep.subr.mxu0 %v1081_v44 }
  0x3d   : > { %483 = vmatpush1.msra.mxu0 %v1080_v25 }
  0x3e   : > { %1082 = vmatmul.mubr.msk.f32.vlgmr.msra.gmra.mrb[0].mxu0 %vm274_vm1, %v459_v26  ;;  %1180 = vmatprep.subr.bf16.mxu0 %v1295_v13 }
  0x3f   : > { %536 = vmatprep.mubr.f32.mxu0 %v1294_v7  ;;  %1182 = vmatpush1.bf16.msra.mxu0 %v1181_v48  ;;  %v1095_v7 = vld [vmem:[%s1769_s2 + $0xe0] sm:$0xff] }
  0x40   : > { %1183 = vmatprep.subr.bf16.mxu0 %v1295_v13  ;;  %v1196_v9 = vpack.c.bf16 %v1096_v8, %v1095_v7 }
  0x42   : > { %1083 = vmatmul.mubr.msk.f32.gmra.mrb[2].mxu0 %vm274_vm1, %v461_v51 }
  0x43   : > { %1185 = vmatpush1.bf16.msra.mxu0 %v1184_v35 }
  0x44   : > { %1186 = vmatprep.subr.bf16.mxu0 %v1295_v13 }
  0x47   : > { %1188 = vmatpush1.bf16.msra.mxu0 %v1187_v54  ;;  %v1108_v54 = vld [vmem:[%s1769_s2 + $0x128] sm:$0xff] }
  0x48   : > { %1189 = vmatprep.subr.bf16.mxu0 %v1295_v13  ;;  %v1235_v56 = vpack.c.bf16 %v1108_v54, %v1107_v53 }
  0x4b   : > { %1191 = vmatpush1.bf16.msra.mxu0 %v1190_v60 }
  0x4c   : > { %1192 = vmatprep.subr.bf16.mxu0 %v1295_v13 }
  0x4f   : > { %1194 = vmatpush1.bf16.msra.mxu0 %v1193_v3 }
  0x50   : > { %1195 = vmatprep.subr.bf16.mxu0 %v1295_v13 }
  0x53   : > { %1197 = vmatpush1.bf16.msra.mxu0 %v1196_v9 }
  0x54   : > { %1198 = vmatprep.subr.bf16.mxu0 %v1295_v13 }
  0x57   : > { %1200 = vmatpush1.bf16.msra.mxu0 %v1199_v16 }
  0x58   : > { %1201 = vmatprep.subr.bf16.mxu0 %v1295_v13 }
  0x5b   : > { %1203 = vmatpush1.bf16.msra.mxu0 %v1202_v19 }
  0x5c   : > { %1204 = vmatprep.subr.bf16.mxu0 %v1295_v13 }
  0x5f   : > { %1206 = vmatpush1.bf16.msra.mxu0 %v1205_v22  ;;  %v1244_v22 = vpack.c.bf16 %v1114_v18, %v1113_v17 }
 0x111   : > { %v532_v33 = vpop.f32.mrb[0].mxu0 }
 0x112   : > { %v559_v36 = vmul.f32 %v552_v30, %v532_v33  ;;  %v534_v37 = vpop.f32.mrb[1].mxu0  ;;  %v1120_v33 = vld [vmem:[%s1769_s2 + $0x188] sm:$0xff] }
 0x113   : > { %v560_v38 = vmul.f32 %v556_v31, %v534_v37  ;;  %v1122_v37 = vld [vmem:[%s1769_s2 + $0x198] sm:$0xff] }
 0x114   : > { %v576_v39 = vadd.f32 %v569_v32, %v559_v36  ;;  %v1121_v36 = vld [vmem:[%s1769_s2 + $0x190] sm:$0xff] }
 0x115   : > { %v577_v40 = vadd.f32 %v573_v34, %v560_v38  ;;  %v538_v41 = vpop.f32.mrb[2].mxu0  ;;  %v1256_v38 = vpack.c.bf16 %v1122_v37, %v1121_v36 }
 0x116   : > { %v580_v42 = vmax.f32 %v576_v39, 0.0  ;;  %v561_v43 = vmul.f32 %v552_v30, %v538_v41  ;;  %v540_v44 = vpop.f32.mrb[3].mxu0  ;;  %v1118_v30 = vld [vmem:[%s1769_s2 + $0x178] sm:$0xff]  ;;  %v1123_v39 = vld [vmem:[%s1769_s2 + $0x1a0] sm:$0xff] }
 0x117   : > { %v581_v45 = vmax.f32 %v577_v40, 0.0  ;;  %v562_v46 = vmul.f32 %v556_v31, %v540_v44  ;;  %v1250_v31 = vpack.c.bf16 %v1118_v30, %v1117_v29  ;;  %v1124_v40 = vld [vmem:[%s1769_s2 + $0x1a8] sm:$0xff] }
 0x118   : > { %v598_v25 = vrot.slane %v580_v42, 7  ;;  %v578_v26 = vadd.f32 %v569_v32, %v561_v43  ;;  %v1119_v32 = vld [vmem:[%s1769_s2 + $0x180] sm:$0xff]  ;;  %v1259_v42 = vpack.c.bf16 %v1124_v40, %v1123_v39 }
 0x119   : > { %v599_v47 = vrot.slane %v581_v45, 7  ;;  %v579_v48 = vadd.f32 %v573_v34, %v562_v46  ;;  %v1253_v34 = vpack.c.bf16 %v1120_v33, %v1119_v32 }
 0x11a   : > { %610 = vst [vmem:[#allocation2] sm:$0xfe] %v598_v25  ;;  %v582_v49 = vmax.f32 %v578_v26, 0.0 }
 0x11b   : > { %612 = vst.msk [vmem:[#allocation2 + $0x8] sm:$0xfe] %vm611_vm4, %v599_v47  ;;  %v583_v50 = vmax.f32 %v579_v48, 0.0 }
 0x11c   : > { %v600_v51 = vrot.slane %v582_v49, 7 }
 0x11d   : > { %v602_v35 = vrot.slane %v583_v50, 7 }
 0x11e   : > { %v1667_v52 = vsel %vm597_vm5, %v598_v25, %v600_v51  ;;  %616 = vst [vmem:[#allocation2 + $0x20] sm:$0x1] %v600_v51 }
 0x11f   : > { %v603_v55 = vsel %vm597_vm5, %v599_v47, %v602_v35  ;;  %618 = vst.msk [vmem:[#allocation2 + $0x28] sm:$0x1] %vm617_vm6, %v602_v35  ;;  %v671_v12 = vrot.slane %v1667_v52, 1  ;;  %v869_v25 = vrot.slane %v1667_v52, 2 }
 0x120   : > { %615 = vst.msk [vmem:[#allocation2 + $0x18] sm:$0xff] %vm614_vm7, %v603_v55 }
 0x121   : > { %v619_v60 = vld [vmem:[#allocation2] sm:$0xff] }
 0x122   : > { %v620_v57 = vld [vmem:[#allocation2 + $0x8] sm:$0xff]  ;;  %v641_v62 = vld [vmem:[#allocation2] sm:$0xfe] }
 0x123   : > { %1105 = vmatprep.mubr.msk.f32.mxu1 %vm614_vm7, %v620_v57  ;;  %v642_v61 = vld [vmem:[#allocation2 + $0x8] sm:$0xfe]  ;;  %v670_v6 = vrot.slane %v641_v62, 1  ;;  %v841_v41 = vld [vmem:[#allocation2] sm:$0xfc] }
 0x124   : > { %831 = vmatmul.mubr.f32.vlgmr.msra.gmra.mrb[0].mxu1 %v619_v60  ;;  %v842_v0 = vld [vmem:[#allocation2 + $0x8] sm:$0xfc]  ;;  %v673_v5 = vrot.slane %v642_v61, 1  ;;  %v868_v44 = vrot.slane %v841_v41, 2 }
 0x125   : > { %1236 = vmatpush1.bf16.msra.mxu1 %v1235_v56  ;;  %v871_v9 = vrot.slane %v842_v0, 2  ;;  %v643_v11 = vld [vmem:[#allocation2 + $0x20] sm:$0x1]  ;;  %v672_v19 = vsel %vm268_vm0, %v670_v6, %v671_v12  ;;  %v1128_v56 = vld [vmem:[%s1771_s4 + $0x1] ss:$0 sm:$0xff] }
 0x126   : > { %1237 = vmatprep.subr.bf16.mxu1 %v1295_v13  ;;  %v644_v3 = vld [vmem:[#allocation2 + $0x28] sm:$0x1]  ;;  %v676_v20 = vrot.slane %v643_v11, 1  ;;  %v843_v46 = vld [vmem:[#allocation2 + $0x20] sm:$0x3]  ;;  %v870_v26 = vsel %vm456_vm2, %v868_v44, %v869_v25 }
 0x127   : > { %v1690_v4 = vld [vmem:[#allocation2 + $0x18] sm:$0xff]  ;;  %v678_v10 = vrot.slane %v644_v3, 1  ;;  %v844_v43 = vld [vmem:[#allocation2 + $0x28] sm:$0x3]  ;;  %v874_v47 = vrot.slane %v843_v46, 2 }
 0x128   : > { %v674_v7 = vrot.slane %v1690_v4, 1  ;;  %1106 = vmatprep.mubr.msk.f32.mxu1 %vm614_vm7, %v1690_v4  ;;  %v872_v8 = vrot.slane %v1690_v4, 2  ;;  %v677_v27 = vsel %vm268_vm0, %v671_v12, %v676_v20  ;;  %v876_v45 = vrot.slane %v844_v43, 2 }
 0x129   : > { %1239 = vmatpush1.bf16.msra.mxu1 %v1238_v63  ;;  %v875_v49 = vsel %vm456_vm2, %v869_v25, %v874_v47 }
 0x12a   : > { %836 = vmatmul.mubr.f32.gmra.mrb[2].mxu1 %v1667_v52  ;;  %v675_v15 = vsel %vm268_vm0, %v673_v5, %v674_v7  ;;  %1240 = vmatprep.subr.bf16.mxu1 %v1295_v13  ;;  %v873_v16 = vsel %vm456_vm2, %v871_v9, %v872_v8  ;;  %v679_v21 = vsel %vm268_vm0, %v674_v7, %v678_v10  ;;  %v1127_v52 = vld [vmem:[%s1771_s4] ss:$0 sm:$0xff] }
 0x12b   : > { %1103 = vmatprep.mubr.msk.f32.mxu0 %vm614_vm7, %v675_v15  ;;  %1125 = vmatprep.mubr.msk.f32.mxu1 %vm614_vm7, %v873_v16  ;;  %v877_v48 = vsel %vm456_vm2, %v872_v8, %v876_v45 }
 0x12c   : > { %751 = vmatmul.mubr.f32.vlgmr.msra.gmra.mrb[4].mxu0 %v672_v19 }
 0x12d   : > { %1242 = vmatpush1.bf16.msra.mxu1 %v1241_v14  ;;  %1104 = vmatprep.mubr.msk.f32.mxu0 %vm614_vm7, %v679_v21 }
 0x12e   : > { %1243 = vmatprep.subr.bf16.mxu1 %v1295_v13 }
 0x130   : > { %756 = vmatmul.mubr.f32.gmra.mrb[6].mxu0 %v677_v27 }
 0x131   : > { %1245 = vmatpush1.bf16.msra.mxu1 %v1244_v22 }
 0x132   : > { %1246 = vmatprep.subr.bf16.mxu1 %v1295_v13 }
 0x135   : > { %1248 = vmatpush1.bf16.msra.mxu1 %v1247_v28 }
 0x136   : > { %1249 = vmatprep.subr.bf16.mxu1 %v1295_v13 }
 0x139   : > { %1251 = vmatpush1.bf16.msra.mxu1 %v1250_v31 }
 0x13a   : > { %1252 = vmatprep.subr.bf16.mxu1 %v1295_v13 }
 0x13d   : > { %1254 = vmatpush1.bf16.msra.mxu1 %v1253_v34 }
 0x13e   : > { %1255 = vmatprep.subr.bf16.mxu1 %v1295_v13 }
 0x141   : > { %1257 = vmatpush1.bf16.msra.mxu1 %v1256_v38 }
 0x142   : > { %1258 = vmatprep.subr.bf16.mxu1 %v1295_v13 }
 0x145   : > { %1260 = vmatpush1.bf16.msra.mxu1 %v1259_v42 }
 0x148   : > { %949 = vmatmul.mubr.f32.vlgmr.msra.gmra.mrb[0].mxu1 %v870_v26 }
 0x149   : > { %1126 = vmatprep.mubr.msk.f32.mxu1 %vm614_vm7, %v877_v48 }
 0x14c   : > { %954 = vmatmul.mubr.f32.gmra.mrb[2].mxu1 %v875_v49 }
 0x1ff   : > { %v752_v50 = vpop.f32.mrb[4].mxu0 }
 0x200   : > { %v754_v13 = vpop.f32.mrb[5].mxu0 }
 0x203   : > { %v757_v51 = vpop.f32.mrb[6].mxu0 }
 0x204   : > { %v759_v35 = vpop.f32.mrb[7].mxu0 }
 0x21b   : > { %v950_v53 = vpop.f32.mrb[0].mxu1 }
 0x21c   : > { %v1261_v54 = vadd.f32 %v950_v53, %v752_v50  ;;  %v952_v55 = vpop.f32.mrb[1].mxu1 }
 0x21e   : > { %v966_v57 = vmul.f32 %v1261_v54, %v1127_v52 }
 0x21f   : > { %v955_v58 = vpop.f32.mrb[2].mxu1 }
 0x220   : > { %v973_v59 = vadd.f32 %v1128_v56, %v966_v57  ;;  %v1262_v60 = vadd.f32 %v955_v58, %v757_v51  ;;  %v957_v61 = vpop.f32.mrb[3].mxu1 }
 0x222   : > { %v975_v62 = vmax.f32 %v973_v59, 0.0  ;;  %v967_v63 = vmul.f32 %v1262_v60, %v1127_v52 }
 0x224   : > { %977 = vst [vmem:[%s224_s21] sm:$0xff] %v975_v62  ;;  %v974_v0 = vadd.f32 %v1128_v56, %v967_v63 }
 0x226   : > { %v976_v1 = vmax.f32 %v974_v0, 0.0 }
 0x228   : > { %978 = vst [vmem:[%s224_s21 + $0x8] sm:$0xff] %v976_v1 }
 0x229 PF: > { %s15_s18 = sadd.s32 1, %s1292_s18  }
 0x22a   : > { %p12_p4 = scmp.ge.s32.totalorder %s15_s18, 4  }
 0x22c   :  { %14 = sbr.rel (!%p12_p4) target bundleno = 1 (0x1), region = 76 }

</bundles_post_ra>
